<compile_context>
chip_gen: v7x
topology: tpu7x:2x2x1
jax: 0.10.0
libtpu: 0.0.40
codegen_flags: <defaults>
</compile_context>

<pallas_src>
import jax
import jax.numpy as jnp
from jax import lax
from jax.experimental import pallas as pl
from jax.experimental.pallas import tpu as pltpu


def _leaky_relu(x, slope=0.01):
    # torch.nn.LeakyReLU default negative_slope = 0.01
    return jnp.where(x >= 0, x, slope * x)


def attention_kernel(q_ref, v_ref, rl_ref,
                     wq_ref, bq_ref, wv_ref, bv_ref, wl_ref, bl_ref,
                     o_ref):
    Bt, L, Dv = v_ref.shape
    A = wq_ref.shape[1]

    v = v_ref[...]                                    # (Bt, L, Dv) f32
    v2 = v.reshape(Bt * L, Dv)

    # values_dense: one big MXU matmul for the whole batch block.
    mv = jnp.dot(v2, wv_ref[...], preferred_element_type=jnp.float32)
    mv = _leaky_relu(mv + bv_ref[...])                # (Bt*L, A)

    # query_dense: one (Bt, Dq) @ (Dq, A) matmul for the block.
    mq = jnp.dot(q_ref[...], wq_ref[...], preferred_element_type=jnp.float32)
    mq = _leaky_relu(mq + bq_ref[...])                # (Bt, A)

    m = mv.reshape(Bt, L, A) + mq[:, None, :]         # (Bt, L, A)
    t = jnp.tanh(m)

    # logit_out: Linear(A, 1) as broadcast-mul (VPU) + lane reduce (XLU);
    # keeps the MXU/result-FIFO free of an N=1 matmul.
    wl_row = wl_ref[...].reshape(1, 1, A)             # (1, 1, A)
    logit = jnp.sum(t * wl_row, axis=-1) + bl_ref[...]  # (Bt, L)
    logit = _leaky_relu(logit)

    # key padding mask: 1-indexed position > real_len -> fill with -1e-09
    # (tiny value kept exactly as in the PyTorch source).
    pos = lax.broadcasted_iota(jnp.int32, (Bt, L), 1) + 1
    logit = jnp.where(pos > rl_ref[...], jnp.float32(-1e-09), logit)

    # softmax along the sequence (lane) axis.
    lmax = jnp.max(logit, axis=-1, keepdims=True)
    e = jnp.exp(logit - lmax)
    prob = e / jnp.sum(e, axis=-1, keepdims=True)     # (Bt, L)

    # weighted sum of values: MXU batched contraction.
    out = jnp.einsum("bql,bld->bqd", prob[:, None, :], v,
                     preferred_element_type=jnp.float32)[:, 0, :]
    o_ref[...] = out.astype(o_ref.dtype)              # (Bt, Dv)


def attention_pallas(query, values, real_len, params, block_b=None):
    """query: [B, Dq] f32, values: [B, L, Dv] f32, real_len: [B] int.

    Weights are stored as [in, out] (transpose of torch nn.Linear).
    """
    wq, bq, wv, bv, wl, bl = params
    B, Dq = query.shape
    _, L, Dv = values.shape
    A = wq.shape[1]

    # Pick a batch block so each grid step feeds ~256 rows (Bt*L) to the MXU.
    # If the block tiles the batch, keep it a multiple of 8 (sublane aligned).
    if block_b is None:
        target = max(1, 256 // max(L, 1))
        block_b = B if target >= B else max(8, (target // 8) * 8)
    Bt = int(block_b)

    # Pad the batch so Bt divides it (padded rows sliced off at the end).
    Bp = pl.cdiv(B, Bt) * Bt
    if Bp != B:
        pad = Bp - B
        query = jnp.pad(query, ((0, pad), (0, 0)))
        values = jnp.pad(values, ((0, pad), (0, 0), (0, 0)))
        real_len = jnp.pad(real_len, ((0, pad),), constant_values=1)

    rl2 = real_len.reshape(Bp, 1).astype(jnp.int32)
    bq2 = bq.reshape(1, A)
    bv2 = bv.reshape(1, A)
    wl2 = wl.reshape(1, A)      # row layout for broadcast-mul in the kernel
    bl2 = bl.reshape(1, 1)

    out = pl.pallas_call(
        attention_kernel,
        out_shape=jax.ShapeDtypeStruct((Bp, Dv), jnp.float32),
        grid=(Bp // Bt,),
        in_specs=[
            pl.BlockSpec((Bt, Dq),    lambda i: (i, 0)),    # query
            pl.BlockSpec((Bt, L, Dv), lambda i: (i, 0, 0)), # values
            pl.BlockSpec((Bt, 1),     lambda i: (i, 0)),    # real_len
            pl.BlockSpec((Dq, A),     lambda i: (0, 0)),    # Wq (grid-invariant)
            pl.BlockSpec((1, A),      lambda i: (0, 0)),    # bq
            pl.BlockSpec((Dv, A),     lambda i: (0, 0)),    # Wv
            pl.BlockSpec((1, A),      lambda i: (0, 0)),    # bv
            pl.BlockSpec((1, A),      lambda i: (0, 0)),    # Wl (as a row)
            pl.BlockSpec((1, 1),      lambda i: (0, 0)),    # bl
        ],
        out_specs=pl.BlockSpec((Bt, Dv), lambda i: (i, 0)),
        compiler_params=pltpu.CompilerParams(
            dimension_semantics=("parallel",),
        ),
    )(query, values, rl2, wq, bq2, wv, bv2, wl2, bl2)

    return out[:B]


def attention_reference(query, values, real_len, params):
    """Pure-JAX mirror of the PyTorch forward for validation."""
    wq, bq, wv, bv, wl, bl = params
    B, L, Dv = values.shape
    mv = _leaky_relu(values @ wv + bv)                           # [B, L, A]
    mq = _leaky_relu(query @ wq + bq)                            # [B, A]
    m = mv + mq[:, None, :]
    logit = _leaky_relu(jnp.tanh(m) @ wl + bl)[..., 0]           # [B, L]
    pos = jnp.arange(1, L + 1)[None, :]
    pad = pos > real_len[:, None]
    logit = jnp.where(pad, jnp.float32(-1e-09), logit)
    prob = jax.nn.softmax(logit, axis=1)
    return jnp.einsum("bl,bld->bd", prob, values)


if __name__ == "__main__":
    # Small, module-consistent shapes.
    B, L = 2, 8
    query_dim, values_dim, atten_dim = 16, 32, 32

    key = jax.random.PRNGKey(0)
    k = jax.random.split(key, 9)

    query = jax.random.normal(k[0], (B, query_dim), dtype=jnp.float32)
    values = jax.random.normal(k[1], (B, L, values_dim), dtype=jnp.float32)
    real_len = jnp.array([5, 8], dtype=jnp.int32)

    # Deterministic synthetic parameters (weights stored as [in, out]).
    wq = 0.2 * jax.random.normal(k[2], (query_dim, atten_dim), dtype=jnp.float32)
    bq = 0.1 * jax.random.normal(k[3], (atten_dim,), dtype=jnp.float32)
    wv = 0.2 * jax.random.normal(k[4], (values_dim, atten_dim), dtype=jnp.float32)
    bv = 0.1 * jax.random.normal(k[5], (atten_dim,), dtype=jnp.float32)
    wl = 0.2 * jax.random.normal(k[6], (atten_dim, 1), dtype=jnp.float32)
    bl = 0.1 * jax.random.normal(k[7], (1,), dtype=jnp.float32)
    params = (wq, bq, wv, bv, wl, bl)

    out = attention_pallas(query, values, real_len, params)
    jax.block_until_ready(out)

    ref = attention_reference(query, values, real_len, params)
    assert out.shape == (B, values_dim)
    assert jnp.allclose(out, ref, rtol=1e-5, atol=1e-5), "mismatch vs reference"

    print("KERNEL_OK")
</pallas_src>

<mosaic_0001>
module attributes {stable_mosaic.version = 11 : i64} {
  func.func @attention_kernel(%arg0: i32, %arg1: memref<2x16xf32, #tpu.memory_space<vmem>>, %arg2: memref<2x8x32xf32, #tpu.memory_space<vmem>>, %arg3: memref<2x1xi32, #tpu.memory_space<vmem>>, %arg4: memref<16x32xf32, #tpu.memory_space<vmem>>, %arg5: memref<1x32xf32, #tpu.memory_space<vmem>>, %arg6: memref<32x32xf32, #tpu.memory_space<vmem>>, %arg7: memref<1x32xf32, #tpu.memory_space<vmem>>, %arg8: memref<1x32xf32, #tpu.memory_space<vmem>>, %arg9: memref<1x1xf32, #tpu.memory_space<vmem>>, %arg10: memref<2x32xf32, #tpu.memory_space<vmem>>) attributes {dimension_semantics = [#tpu.dimension_semantics<parallel>], iteration_bounds = array<i64: 1>, scalar_prefetch = 0 : i64, scratch_operands = 0 : i64, tpu.core_type = #tpu.core_type<tc>, window_params = [{transform_indices = @transform_0, window_bounds = array<i64: 2, 16>}, {transform_indices = @transform_1, window_bounds = array<i64: 2, 8, 32>}, {transform_indices = @transform_2, window_bounds = array<i64: 2, 1>}, {pipeline_mode = #tpu.pipeline_mode<synchronous>, transform_indices = @transform_3, window_bounds = array<i64: 16, 32>}, {pipeline_mode = #tpu.pipeline_mode<synchronous>, transform_indices = @transform_4, window_bounds = array<i64: 1, 32>}, {pipeline_mode = #tpu.pipeline_mode<synchronous>, transform_indices = @transform_5, window_bounds = array<i64: 32, 32>}, {pipeline_mode = #tpu.pipeline_mode<synchronous>, transform_indices = @transform_6, window_bounds = array<i64: 1, 32>}, {pipeline_mode = #tpu.pipeline_mode<synchronous>, transform_indices = @transform_7, window_bounds = array<i64: 1, 32>}, {pipeline_mode = #tpu.pipeline_mode<synchronous>, transform_indices = @transform_8, window_bounds = array<i64: 1, 1>}, {transform_indices = @transform_9, window_bounds = array<i64: 2, 32>}]} {
    %c0 = arith.constant 0 : index
    %c0_0 = arith.constant 0 : index
    %c0_1 = arith.constant 0 : index
    %0 = vector.load %arg2[%c0, %c0_0, %c0_1] : memref<2x8x32xf32, #tpu.memory_space<vmem>>, vector<2x8x32xf32>
    %1 = vector.shape_cast %0 : vector<2x8x32xf32> to vector<16x32xf32>
    %c0_2 = arith.constant 0 : index
    %c0_3 = arith.constant 0 : index
    %2 = vector.load %arg6[%c0_2, %c0_3] : memref<32x32xf32, #tpu.memory_space<vmem>>, vector<32x32xf32>
    %cst = arith.constant dense<0.000000e+00> : vector<16x32xf32>
    %3 = tpu.matmul %1, %2, %cst {dimension_numbers = #tpu.dot_dimension_numbers<[1], [0], [0], [1], [0, 0, 1, 1], [], []>} : vector<16x32xf32>, vector<32x32xf32>, vector<16x32xf32> -> vector<16x32xf32>
    %c0_4 = arith.constant 0 : index
    %c0_5 = arith.constant 0 : index
    %4 = vector.load %arg7[%c0_4, %c0_5] : memref<1x32xf32, #tpu.memory_space<vmem>>, vector<1x32xf32>
    %5 = vector.broadcast %4 : vector<1x32xf32> to vector<16x32xf32>
    %6 = arith.addf %3, %5 : vector<16x32xf32>
    %cst_6 = arith.constant 0.000000e+00 : f32
    %7 = vector.broadcast %cst_6 : f32 to vector<16x32xf32>
    %8 = arith.cmpf oge, %6, %7 : vector<16x32xf32>
    %cst_7 = arith.constant 0.00999999977 : f32
    %9 = vector.broadcast %cst_7 : f32 to vector<16x32xf32>
    %10 = arith.mulf %9, %6 : vector<16x32xf32>
    %11 = arith.select %8, %6, %10 : vector<16x32xi1>, vector<16x32xf32>
    %c0_8 = arith.constant 0 : index
    %c0_9 = arith.constant 0 : index
    %12 = vector.load %arg1[%c0_8, %c0_9] : memref<2x16xf32, #tpu.memory_space<vmem>>, vector<2x16xf32>
    %c0_10 = arith.constant 0 : index
    %c0_11 = arith.constant 0 : index
    %13 = vector.load %arg4[%c0_10, %c0_11] : memref<16x32xf32, #tpu.memory_space<vmem>>, vector<16x32xf32>
    %cst_12 = arith.constant dense<0.000000e+00> : vector<2x32xf32>
    %14 = tpu.matmul %12, %13, %cst_12 {dimension_numbers = #tpu.dot_dimension_numbers<[1], [0], [0], [1], [0, 0, 1, 1], [], []>} : vector<2x16xf32>, vector<16x32xf32>, vector<2x32xf32> -> vector<2x32xf32>
    %c0_13 = arith.constant 0 : index
    %c0_14 = arith.constant 0 : index
    %15 = vector.load %arg5[%c0_13, %c0_14] : memref<1x32xf32, #tpu.memory_space<vmem>>, vector<1x32xf32>
    %16 = vector.broadcast %15 : vector<1x32xf32> to vector<2x32xf32>
    %17 = arith.addf %14, %16 : vector<2x32xf32>
    %cst_15 = arith.constant 0.000000e+00 : f32
    %18 = vector.broadcast %cst_15 : f32 to vector<2x32xf32>
    %19 = arith.cmpf oge, %17, %18 : vector<2x32xf32>
    %cst_16 = arith.constant 0.00999999977 : f32
    %20 = vector.broadcast %cst_16 : f32 to vector<2x32xf32>
    %21 = arith.mulf %20, %17 : vector<2x32xf32>
    %22 = arith.select %19, %17, %21 : vector<2x32xi1>, vector<2x32xf32>
    %23 = vector.shape_cast %11 : vector<16x32xf32> to vector<2x8x32xf32>
    %24 = vector.shape_cast %22 : vector<2x32xf32> to vector<2x1x32xf32>
    %25 = vector.broadcast %24 : vector<2x1x32xf32> to vector<2x8x32xf32>
    %26 = arith.addf %23, %25 : vector<2x8x32xf32>
    %27 = math.tanh %26 : vector<2x8x32xf32>
    %c0_17 = arith.constant 0 : index
    %c0_18 = arith.constant 0 : index
    %28 = vector.load %arg8[%c0_17, %c0_18] : memref<1x32xf32, #tpu.memory_space<vmem>>, vector<1x32xf32>
    %29 = vector.shape_cast %28 : vector<1x32xf32> to vector<1x1x32xf32>
    %30 = vector.broadcast %29 : vector<1x1x32xf32> to vector<2x8x32xf32>
    %31 = arith.mulf %27, %30 : vector<2x8x32xf32>
    %cst_19 = arith.constant dense<0.000000e+00> : vector<2x8xf32>
    %32 = vector.multi_reduction <add>, %31, %cst_19 [2] : vector<2x8x32xf32> to vector<2x8xf32>
    %c0_20 = arith.constant 0 : index
    %c0_21 = arith.constant 0 : index
    %33 = vector.load %arg9[%c0_20, %c0_21] : memref<1x1xf32, #tpu.memory_space<vmem>>, vector<1x1xf32>
    %34 = vector.broadcast %33 : vector<1x1xf32> to vector<2x8xf32>
    %35 = arith.addf %32, %34 : vector<2x8xf32>
    %cst_22 = arith.constant 0.000000e+00 : f32
    %36 = vector.broadcast %cst_22 : f32 to vector<2x8xf32>
    %37 = arith.cmpf oge, %35, %36 : vector<2x8xf32>
    %cst_23 = arith.constant 0.00999999977 : f32
    %38 = vector.broadcast %cst_23 : f32 to vector<2x8xf32>
    %39 = arith.mulf %38, %35 : vector<2x8xf32>
    %40 = arith.select %37, %35, %39 : vector<2x8xi1>, vector<2x8xf32>
    %41 = tpu.iota {dimensions = array<i32: 1>} : vector<2x8xi32>
    %c1_i32 = arith.constant 1 : i32
    %42 = vector.broadcast %c1_i32 : i32 to vector<2x8xi32>
    %43 = arith.addi %41, %42 : vector<2x8xi32>
    %c0_24 = arith.constant 0 : index
    %c0_25 = arith.constant 0 : index
    %44 = vector.load %arg3[%c0_24, %c0_25] : memref<2x1xi32, #tpu.memory_space<vmem>>, vector<2x1xi32>
    %45 = vector.broadcast %44 : vector<2x1xi32> to vector<2x8xi32>
    %46 = arith.cmpi sgt, %43, %45 : vector<2x8xi32>
    %cst_26 = arith.constant -9.99999971E-10 : f32
    %47 = vector.broadcast %cst_26 : f32 to vector<2x8xf32>
    %48 = arith.select %46, %47, %40 : vector<2x8xi1>, vector<2x8xf32>
    %cst_27 = arith.constant dense<0xFF800000> : vector<2xf32>
    %49 = vector.multi_reduction <maximumf>, %48, %cst_27 [1] : vector<2x8xf32> to vector<2xf32>
    %50 = vector.shape_cast %49 : vector<2xf32> to vector<2x1xf32>
    %51 = vector.broadcast %50 : vector<2x1xf32> to vector<2x8xf32>
    %52 = arith.subf %48, %51 : vector<2x8xf32>
    %53 = math.exp %52 : vector<2x8xf32>
    %cst_28 = arith.constant dense<0.000000e+00> : vector<2xf32>
    %54 = vector.multi_reduction <add>, %53, %cst_28 [1] : vector<2x8xf32> to vector<2xf32>
    %55 = vector.shape_cast %54 : vector<2xf32> to vector<2x1xf32>
    %56 = vector.broadcast %55 : vector<2x1xf32> to vector<2x8xf32>
    %57 = arith.divf %53, %56 : vector<2x8xf32>
    %58 = vector.shape_cast %57 : vector<2x8xf32> to vector<2x1x8xf32>
    "tpu.trace_start"() <{level = 10 : i32, message = "bql,bld->bqd"}> : () -> ()
    %cst_29 = arith.constant dense<0.000000e+00> : vector<2x1x32xf32>
    %59 = tpu.matmul %58, %0, %cst_29 {dimension_numbers = #tpu.dot_dimension_numbers<[2], [1], [1], [2], [0, 0, 0, 1, 1, 2], [0], [0]>} : vector<2x1x8xf32>, vector<2x8x32xf32>, vector<2x1x32xf32> -> vector<2x1x32xf32>
    "tpu.trace_stop"() : () -> ()
    %60 = vector.shape_cast %59 : vector<2x1x32xf32> to vector<2x32xf32>
    %c0_30 = arith.constant 0 : index
    %c0_31 = arith.constant 0 : index
    %61 = vector.load %arg10[%c0_30, %c0_31] : memref<2x32xf32, #tpu.memory_space<vmem>>, vector<2x32xf32>
    tpu.vector_store %arg10[%c0_30, %c0_31], %60 {strides = array<i32>} : memref<2x32xf32, #tpu.memory_space<vmem>>, vector<2x32xf32>,
    return
  }
  func.func @transform_0(%arg0: i32) -> (i32, i32) {
    %c0_i32 = arith.constant 0 : i32
    %c0_i32_0 = arith.constant 0 : i32
    return %arg0, %c0_i32 : i32, i32
  }
  func.func @transform_1(%arg0: i32) -> (i32, i32, i32) {
    %c0_i32 = arith.constant 0 : i32
    %c0_i32_0 = arith.constant 0 : i32
    %c0_i32_1 = arith.constant 0 : i32
    return %arg0, %c0_i32, %c0_i32_0 : i32, i32, i32
  }
  func.func @transform_2(%arg0: i32) -> (i32, i32) {
    %c0_i32 = arith.constant 0 : i32
    %c0_i32_0 = arith.constant 0 : i32
    return %arg0, %c0_i32 : i32, i32
  }
  func.func @transform_3(%arg0: i32) -> (i32, i32) {
    %c0_i32 = arith.constant 0 : i32
    %c0_i32_0 = arith.constant 0 : i32
    %c0_i32_1 = arith.constant 0 : i32
    return %c0_i32, %c0_i32_0 : i32, i32
  }
  func.func @transform_4(%arg0: i32) -> (i32, i32) {
    %c0_i32 = arith.constant 0 : i32
    %c0_i32_0 = arith.constant 0 : i32
    %c0_i32_1 = arith.constant 0 : i32
    return %c0_i32, %c0_i32_0 : i32, i32
  }
  func.func @transform_5(%arg0: i32) -> (i32, i32) {
    %c0_i32 = arith.constant 0 : i32
    %c0_i32_0 = arith.constant 0 : i32
    %c0_i32_1 = arith.constant 0 : i32
    return %c0_i32, %c0_i32_0 : i32, i32
  }
  func.func @transform_6(%arg0: i32) -> (i32, i32) {
    %c0_i32 = arith.constant 0 : i32
    %c0_i32_0 = arith.constant 0 : i32
    %c0_i32_1 = arith.constant 0 : i32
    return %c0_i32, %c0_i32_0 : i32, i32
  }
  func.func @transform_7(%arg0: i32) -> (i32, i32) {
    %c0_i32 = arith.constant 0 : i32
    %c0_i32_0 = arith.constant 0 : i32
    %c0_i32_1 = arith.constant 0 : i32
    return %c0_i32, %c0_i32_0 : i32, i32
  }
  func.func @transform_8(%arg0: i32) -> (i32, i32) {
    %c0_i32 = arith.constant 0 : i32
    %c0_i32_0 = arith.constant 0 : i32
    %c0_i32_1 = arith.constant 0 : i32
    return %c0_i32, %c0_i32_0 : i32, i32
  }
  func.func @transform_9(%arg0: i32) -> (i32, i32) {
    %c0_i32 = arith.constant 0 : i32
    %c0_i32_0 = arith.constant 0 : i32
    return %arg0, %c0_i32 : i32, i32
  }
}

</mosaic_0001>

<bundles_post_ra>
// kernel: tpu_custom_call.1
= control target key start
LH: loop header
LB: loop body
LE: loop exit
PB: predicated region body
PF: predicated region fallthrough
CT: control target
= control target key end

     0   :  { %s836_s0 = inlined_call_operand.vmem [shape: f32[2,16], index: 0, kind: input, shape index: {}]   ;;  %s837_s1 = inlined_call_operand.hbm [shape: f32[2,8,32], index: 1, kind: input, shape index: {}]   ;;  %s838_s2 = inlined_call_operand.vmem [shape: s32[2,1], index: 2, kind: input, shape index: {}]   ;;  %s839_s3 = inlined_call_operand.vmem [shape: f32[16,32], index: 3, kind: input, shape index: {}]   ;;  %s840_s4 = inlined_call_operand.vmem [shape: f32[1,32], index: 4, kind: input, shape index: {}]   ;;  %s841_s5 = inlined_call_operand.hbm [shape: f32[32,32], index: 5, kind: input, shape index: {}]   ;;  %s842_s6 = inlined_call_operand.vmem [shape: f32[1,32], index: 6, kind: input, shape index: {}]   ;;  %s843_s7 = inlined_call_operand.vmem [shape: f32[1,32], index: 7, kind: input, shape index: {}]   ;;  %s844_s8 = inlined_call_operand.<no memory space> [shape: f32[1,1], index: 8, kind: input, shape index: {}]   ;;  %s845_s9 = inlined_call_operand.hbm [shape: f32[2,32], index: 9, kind: output, shape index: {}]  }
   0x1   :  { %v14_v0 = vstv %s844_s8 }
   0x2   :  { %15 = vst [vmem:[#allocation2] sm:$0x1] %v14_v0 }
   0x3   :  { %16 = vsyncpa [#allocation4], 0 }
   0x4   :  { %17 = vsyncpa [#allocation7], 0 }
   0x5   :  { %18 = vsyncpa [#allocation5], 0  ;;  %s699_s11 = smov [#allocation3]   ;;  %s627_s15 = scalar_lea.hbm %s837_s1, 256 }
   0x6   :  { %s26_s12 = sshll.u32 %s699_s11, 4  ;;  %p628_p0 = scmp.ne.s32.totalorder %s837_s1, %s627_s15  ;;  %s27_s12 = int_to_ptr.vmem [resolvable:$true] %s26_s12 }
   0x7   :  { %p631_p1 = scmp.lt.u32.totalorder %s627_s15, %s837_s1 }
   0x9   :  { %p633_p2 = pnand %p631_p1, %p628_p0 }
   0xb   :  { %636 = shalt.err (!%p633_p2)
}
   0xc   :  { %s637_s8 = scalar_lea.vmem %s27_s12, 256  ;;  %p642_p4 = scmp.lt.s32.totalorder %s27_s12, %s27_s12 }
   0xd   :  { %p638_p3 = scmp.ne.s32.totalorder %s27_s12, %s637_s8  ;;  %p643_p5 = scmp.lt.s32.totalorder %s637_s8, %s637_s8 }
   0xf   :  { %p644_p6 = por %p643_p5, %p642_p4 }
  0x11   :  { %p645_p7 = pnand %p644_p6, %p638_p3 }
  0x13   :  { %648 = shalt.err (!%p645_p7)
}
  0x14   :  { %s700_s20 = smov 128   ;;  %s701_s21 = smov 8  }
  0x15   :  { %32 = dma.hbm_to_vmem [thread:$0]  %s837_s1, 256, %s27_s12, [#allocation4], %s700_s20, %s700_s20, %s701_s21  }
  0x16   :  { %s702_s24 = smov [#allocation6]   ;;  %s649_s28 = scalar_lea.hbm %s841_s5, 512 }
  0x17   :  { %s44_s25 = sshll.u32 %s702_s24, 4  ;;  %p650_p8 = scmp.ne.s32.totalorder %s841_s5, %s649_s28  ;;  %s45_s25 = int_to_ptr.vmem [resolvable:$true] %s44_s25 }
  0x18   :  { %p653_p9 = scmp.lt.u32.totalorder %s649_s28, %s841_s5 }
  0x1a   :  { %p655_p10 = pnand %p653_p9, %p650_p8 }
  0x1c   :  { %658 = shalt.err (!%p655_p10)
}
  0x1d   :  { %s659_s13 = scalar_lea.vmem %s45_s25, 512  ;;  %p664_p12 = scmp.lt.s32.totalorder %s45_s25, %s45_s25 }
  0x1e   :  { %p660_p11 = scmp.ne.s32.totalorder %s45_s25, %s659_s13  ;;  %p665_p13 = scmp.lt.s32.totalorder %s659_s13, %s659_s13 }
  0x20   :  { %p666_p0 = por %p665_p13, %p664_p12 }
  0x22   :  { %p667_p1 = pnand %p666_p0, %p660_p11 }
  0x24   :  { %670 = shalt.err (!%p667_p1)
}
  0x25   :  { %50 = dma.hbm_to_vmem [thread:$0]  %s841_s5, 512, %s45_s25, [#allocation7], %s700_s20, %s700_s20, %s701_s21  }
  0x26   :  { %693 = dma.done.wait [#allocation4], 256  }
  0x27   :  { %694 = vsyncadd [#allocation4], 4294967040 }
  0x28   :  { %695 = dma.done.wait [#allocation7], 512  }
  0x29   :  { %696 = vsyncadd [#allocation7], 4294966784  ;;  %v703_v1 = vmov 0.0|0.0   ;;  %vm704_vm0 = vmmov 0   ;;  %v705_v2 = vmov 0.0   ;;  %v65_v3 = vld [vmem:[#allocation6] sm:$0xff]  ;;  %v255_v20 = vlaneseq }
  0x2a   :  { %604 = vmatprep.subr.bf16.mxu1 %v703_v1  ;;  %583 = vmatprep.mubr.msk.f32.mxu1 %vm704_vm0, %v705_v2  ;;  %v66_v4 = vld [vmem:[#allocation6 + $0x8] sm:$0xff]  ;;  %vm76_vm1 = vcmask 261120   ;;  %v166_v7 = vld [vmem:[%s839_s3 + $0x8] sm:$0xff]  ;;  %vm174_vm2 = vcmask 130048   ;;  %v706_v16 = vmov 0   ;;  %vm339_vm8 = vcmask 1041409  }
  0x2b   :  { %v165_v5 = vld [vmem:[%s839_s3] sm:$0xff]  ;;  %v596_v6 = vpack.c.bf16 %v66_v4, %v65_v3  ;;  %v68_v10 = vld [vmem:[#allocation6 + $0x18] sm:$0xff]  ;;  %617 = vset.pattern.permute.xlu1 %v706_v16  ;;  %618 = vset.pattern.permute.xlu0 %v706_v16  ;;  %v707_v18 = vmov 1966171168   ;;  %v256_v23 = vshrl.u32 %v255_v20, 7  ;;  %v322_v58 = vand.u32 127, %v255_v20 }
  0x2c   :  { %v67_v8 = vld [vmem:[#allocation6 + $0x10] sm:$0xff]  ;;  %v605_v9 = vpack.c.bf16 %v166_v7, %v165_v5  ;;  %v64_v14 = vld [vmem:[#allocation3 + $0x8] sm:$0xff]  ;;  %v552_v15 = vld [vmem:[#allocation2] ss:$0 sm:$0xff]  ;;  %v253_v19 = vunpack.c.l.s4 %v707_v18  ;;  %vm343_vm9 = vcmask 58368   ;;  %vm378_vm11 = vcmask 64512  }
  0x2d   :  { %v63_v11 = vld [vmem:[#allocation3] sm:$0xff]  ;;  %597 = vmatprep.subr.bf16.mxu0 %v596_v6  ;;  %v600_v12 = vpack.c.bf16 %v68_v10, %v67_v8  ;;  %310 = vperm.xlu1 %617, %v552_v15   ;;  %v549_v21 = vld [vmem:[%s840_s4] ss:$0 sm:$0xff]  ;;  %v276_v35 = vsub.s32 0, %v256_v23  ;;  %v333_v62 = vsub.s32 %v322_v58, %v256_v23  ;;  %v323_v1 = vadd.s32 1, %v322_v58 }
  0x2e   :  { %576 = vmatprep.mubr.msk.f32.mxu0 %vm76_vm1, %v63_v11  ;;  %606 = vmatpush3.bf16.msra.mxu1 %v605_v9  ;;  %v164_v13 = vld [vmem:[%s836_s0] sm:$0x3]  ;;  %v254_v22 = vunpack.c.0.s8 %v253_v19  ;;  %vm528_vm12 = vcmask 254976  }
  0x2f   :  { %599 = vmatpush3.bf16.msra.mxu0 %v596_v6  ;;  %586 = vmatprep.subr.mxu1 %v705_v2  ;;  %v324_v17 = vld [vmem:[%s838_s2] sm:$0x3] }
  0x30   :  { %601 = vmatprep.subr.bf16.mxu0 %v600_v12  ;;  %v806_v27 = vsub.s32 %v254_v22, %v256_v23  ;;  %v546_v28 = vld [vmem:[%s842_s6] ss:$0 sm:$0xff]  ;;  %s708_s6 = smov [#allocation8]  }
  0x31   :  { %584 = vmatmul.mubr.msk.f32.vlgmr.msra.gmra.mrb[0].mxu1 %vm174_vm2, %v164_v13  ;;  %326 = vperm.xlu1 %617, %v324_v17   ;;  %v551_v48 = vld [vmem:[%s843_s7] ss:$0 sm:$0xff]  ;;  %s536_s7 = sshll.u32 %s708_s6, 4  ;;  %s537_s7 = int_to_ptr.vmem [resolvable:$true] %s536_s7 }
  0x32   :  { %587 = vmatpush3.msra.mxu1 %v63_v11  ;;  %588 = vmatprep.mubr.msk.f32.mxu1 %vm704_vm0, %v705_v2  ;;  %s671_s22 = scalar_lea.vmem %s537_s7, 32  ;;  %p676_p3 = scmp.lt.s32.totalorder %s537_s7, %s537_s7 }
  0x33   :  { %603 = vmatpush3.bf16.msra.mxu0 %v600_v12  ;;  %p672_p2 = scmp.ne.s32.totalorder %s537_s7, %s671_s22  ;;  %p677_p4 = scmp.lt.s32.totalorder %s671_s22, %s671_s22 }
  0x34   :  { %591 = vmatprep.subr.mxu0 %v705_v2 }
  0x35   :  { %p678_p5 = por %p677_p4, %p676_p3 }
  0x36   :  { %577 = vmatmul.mubr.msk.f32.vlgmr.msra.gmra.mrb[0].mxu0 %vm76_vm1, %v64_v14 }
  0x37   :  { %592 = vmatpush3.msra.mxu0 %v64_v14  ;;  %593 = vmatprep.mubr.msk.f32.mxu0 %vm704_vm0, %v705_v2  ;;  %p679_p6 = pnand %p678_p5, %p672_p2 }
  0xac   :  { %v311_v55 = vpop.permute.xlu1 %310 }
  0xb0   :  { %v327_v2 = vpop.permute.xlu1 %326 }
  0xb1   :  { %vm328_vm10 = vcmp.gt.s32.totalorder %v323_v1, %v327_v2 }
 0x104   :  { %v244_v24 = vpop.f32.mrb[0].mxu1 }
 0x105   :  { %v245_v25 = vadd.f32 %v549_v21, %v244_v24  ;;  %v585_v26 = vpop.f32.mrb[1].mxu1 }
 0x107   :  { %vm248_vm3 = vcmp.ge.f32.partialorder %v245_v25, 0.0  ;;  %v249_v29 = vmul.f32 0.01, %v245_v25 }
 0x109   :  { %v578_v30 = vpop.f32.mrb[0].mxu0  ;;  %v250_v31 = vsel %vm248_vm3, %v245_v25, %v249_v29 }
 0x10a   :  { %v155_v32 = vadd.f32 %v578_v30, %v546_v28  ;;  %v149_v33 = vpop.f32.mrb[1].mxu0  ;;  %v258_v34 = vrot.slane %v250_v31, %v806_v27 }
 0x10b   :  { %v150_v36 = vadd.f32 %v546_v28, %v149_v33 }
 0x10c   :  { %v259_v37 = vcombine.high %v258_v34, %v258_v34  ;;  %v266_v38 = vrot.slane %v258_v34, %v806_v27  ;;  %v161_v40 = vmul.f32 0.01, %v155_v32  ;;  %vm159_vm5 = vcmp.ge.f32.partialorder %v155_v32, 0.0 }
 0x10d   :  { %vm158_vm4 = vcmp.ge.f32.partialorder %v150_v36, 0.0  ;;  %v160_v39 = vmul.f32 0.01, %v150_v36 }
 0x10e   :  { %v273_v41 = vrot.slane %v259_v37, %v806_v27  ;;  %v277_v43 = vrot.slane %v266_v38, %v276_v35  ;;  %v163_v46 = vsel %vm159_vm5, %v155_v32, %v161_v40 }
 0x10f   :  { %v162_v42 = vsel %vm158_vm4, %v150_v36, %v160_v39 }
 0x110   :  { %v281_v44 = vrot.slane %v273_v41, %v276_v35  ;;  %v284_v45 = vadd.f32 %v277_v43, %v162_v42 }
 0x112   :  { %v285_v47 = vadd.f32 %v281_v44, %v163_v46  ;;  %619 = vtanh.f32 %v284_v45 }
 0x114   :  { %621 = vtanh.f32 %v285_v47 }
 0x11c   :  { %v620_v49 = vpop.eup %619 }
 0x11d   :  { %v295_v50 = vmul.f32 %v620_v49, %v551_v48 }
 0x11e   :  { %v622_v51 = vpop.eup %621 }
 0x11f   :  { %v297_v52 = vsel %vm76_vm1, %v295_v50, 0.0  ;;  %v296_v53 = vmul.f32 %v622_v51, %v551_v48 }
 0x120   :  { %298 = vadd.xlane.f32.xlu0 %v297_v52 }
 0x121   :  { %v300_v54 = vsel %vm76_vm1, %v296_v53, 0.0 }
 0x124   :  { %301 = vadd.xlane.f32.xlu0 %v300_v54 }
 0x1ad   :  { %v299_v56 = vpop.xlane.xlu0 %298 }
 0x1ae   :  { %v313_v57 = vadd.f32 %v311_v55, %v299_v56 }
 0x1b0   :  { %v317_v59 = vmul.f32 0.01, %v313_v57  ;;  %vm315_vm6 = vcmp.ge.f32.partialorder %v313_v57, 0.0 }
 0x1b1   :  { %v302_v60 = vpop.xlane.xlu0 %301 }
 0x1b2   :  { %v314_v61 = vadd.f32 %v311_v55, %v302_v60  ;;  %v319_v63 = vsel %vm315_vm6, %v313_v57, %v317_v59 }
 0x1b3   :  { %v334_v5 = vrot.slane %v319_v63, %v333_v62 }
 0x1b4   :  { %vm316_vm7 = vcmp.ge.f32.partialorder %v314_v61, 0.0  ;;  %v318_v0 = vmul.f32 0.01, %v314_v61 }
 0x1b6   :  { %v320_v3 = vsel %vm316_vm7, %v314_v61, %v318_v0 }
 0x1b7   :  { %v338_v4 = vrot.slane %v320_v3, %v333_v62 }
 0x1b9   :  { %v340_v6 = vsel %vm339_vm8, %v338_v4, %v334_v5 }
 0x1ba   :  { %v342_v7 = vsel %vm328_vm10, -1e-09, %v340_v6 }
 0x1bb   :  { %v344_v8 = vsel %vm343_vm9, %v342_v7, -inf }
 0x1bc   :  { %345 = vmax.xlane.f32.xlu0 %v344_v8 }
 0x249   :  { %v346_v9 = vpop.xlane.xlu0 %345 }
 0x24a   :  { %v347_v10 = vsub.f32 %v342_v7, %v346_v9 }
 0x24c   :  { %v348_v11 = vmul.f32 1.442695, %v347_v10 }
 0x24e   :  { %623 = vpow2.f32 %v348_v11 }
 0x258   :  { %v624_v12 = vpop.eup %623 }
 0x259   :  { %v350_v13 = vsel %vm343_vm9, %v624_v12, 0.0 }
 0x25a   :  { %351 = vadd.xlane.f32.xlu1 %v350_v13 }
 0x2e7   :  { %v352_v14 = vpop.xlane.xlu1 %351 }
 0x2e8   :  { %625 = vrcp.f32 %v352_v14 }
 0x2f2   :  { %v626_v15 = vpop.eup %625 }
 0x2f3   :  { %v354_v16 = vmul.f32 %v626_v15, %v624_v12 }
 0x2f5   :  { %v362_v17 = vrot.slane %v354_v16, %v806_v27 }
 0x2f7   :  { %v370_v18 = vrot.slane %v362_v17, %v806_v27  ;;  %v363_v19 = vcombine.high %v362_v17, %v362_v17 }
 0x2f9   :  { %589 = vmatmul.mubr.msk.f32.vlgmr.msra.gmra.mrb[2].mxu1 %vm378_vm11, %v370_v18  ;;  %v377_v20 = vrot.slane %v363_v19, %v806_v27 }
 0x2fb   :  { %594 = vmatmul.mubr.msk.f32.vlgmr.msra.gmra.mrb[2].mxu0 %vm378_vm11, %v377_v20 }
 0x3cc   :  { %v447_v21 = vpop.f32.mrb[2].mxu1 }
 0x3cd   :  { %v590_v22 = vpop.f32.mrb[3].mxu1 }
 0x3ce   :  { %v519_v23 = vpop.f32.mrb[2].mxu0 }
 0x3cf   :  { %v525_v24 = vrot.slane %v519_v23, 7  ;;  %v595_v25 = vpop.f32.mrb[3].mxu0 }
 0x3d1   :  { %v526_v26 = vsel %vm339_vm8, %v525_v24, %v447_v21 }
 0x3d2   :  { %529 = vst.msk [vmem:[#allocation8] sm:$0x3] %vm528_vm12, %v526_v26 }
 0x3d3   :  { %682 = shalt.err (!%p679_p6)
}
 0x3d4   :  { %s683_s25 = scalar_lea.hbm %s845_s9, 32 }
 0x3d5   :  { %p684_p7 = scmp.ne.s32.totalorder %s845_s9, %s683_s25  ;;  %p687_p8 = scmp.lt.u32.totalorder %s683_s25, %s845_s9 }
 0x3d7   :  { %p689_p9 = pnand %p687_p8, %p684_p7 }
 0x3d9   :  { %692 = shalt.err (!%p689_p9)
}
 0x3da   :  { %539 = dma.vmem_to_hbm [thread:$0]  %s537_s7, 32, %s845_s9, [#allocation5]  }
 0x3db   :  { %697 = dma.done.wait [#allocation5], 32  }
 0x3dc   :  { %698 = vsyncadd [#allocation5], 4294967264 }
 0x3dd   :  { %543 = vsyncpa [#allocation4], 1 }
 0x3de   :  { %544 = vsyncpa [#allocation7], 1 }
 0x3df   :  { %545 = vsyncpa [#allocation5], 1 }

</bundles_post_ra>
